<compile_context>
chip_gen: v7x
topology: tpu7x:2x2x1
jax: 0.10.0
libtpu: 0.0.40
codegen_flags: <defaults>
</compile_context>

<pallas_src>
import math

import jax
import jax.numpy as jnp
from jax.experimental import pallas as pl
from jax.experimental.pallas import tpu as pltpu


def _round_up(x: int, m: int) -> int:
    return ((x + m - 1) // m) * m


def _pick_tile(n: int, candidates, align: int) -> int:
    """Largest candidate tile whose padding overhead is <= 12.5%, else `align`."""
    for t in candidates:
        pad = _round_up(n, t) - n
        if pad * 8 <= n:
            return t
    return align


def _gemv_kernel(wl_ref, wr_ref, r_ref, left_ref, right_ref):
    # r_ref: (tm, H) rows of repres; wl_ref / wr_ref: (1, H).
    # VPU broadcast-multiply + lane reduce: keeps the 1-wide GEMVs off the MXU
    # and avoids any (1, H) -> (H, 1) relayout.
    r = r_ref[...].astype(jnp.float32)
    left_ref[...] = jnp.sum(r * wl_ref[...].astype(jnp.float32),
                            axis=-1, keepdims=True)            # (tm, 1)
    right_ref[...] = jnp.sum(r * wr_ref[...].astype(jnp.float32),
                             axis=-1, keepdims=True)           # (tm, 1)


def _bcast_add_kernel(right_ref, left_ref, o_ref):
    # right_ref: (tm, 1)  -- <weight_right, repres[i]>, varies with row tile i
    # left_ref : (1, tn)  -- <weight_left,  repres[j]>, lane-major, varies
    #                        with col tile j
    # Pure VPU broadcast-add; lane-dense full-width stores, zero transposes.
    o_ref[...] = (right_ref[...] + left_ref[...]).astype(o_ref.dtype)


def sample_weighter_forward(weight_left, weight_right, repres, *,
                            out_dtype=jnp.float32):
    """Pallas TPU implementation of sampel_weighter.forward.

    out_dtype: set to jnp.bfloat16 to halve output writeback if the consumer
               tolerates it (the N^2 kernel is purely writeback bound).
    """
    N, H = repres.shape
    assert weight_left.shape == (1, H) and weight_right.shape == (1, H)

    # Adaptive, lane-dense tiles (tm sublane-aligned, tn lane-aligned); bounded
    # padding overhead; tiles always divide the padded extents.
    tm = _pick_tile(N, (256, 128, 64, 32, 16, 8), 8)
    tn = _pick_tile(N, (2048, 1024, 512, 256, 128), 128)
    n_row = _round_up(N, tm)      # padded row extent
    n_col = _round_up(N, tn)      # padded col extent

    r_pad = repres if n_row == N else jnp.pad(repres, ((0, n_row - N), (0, 0)))

    # ---- prologue: both GEMVs in a single HBM pass over repres -------------
    left_col, right_col = pl.pallas_call(
        _gemv_kernel,
        out_shape=(jax.ShapeDtypeStruct((n_row, 1), jnp.float32),
                   jax.ShapeDtypeStruct((n_row, 1), jnp.float32)),
        grid_spec=pltpu.PrefetchScalarGridSpec(
            num_scalar_prefetch=0,
            grid=(n_row // tm,),
            in_specs=[
                pl.BlockSpec((1, H), lambda i: (0, 0)),     # weight_left
                pl.BlockSpec((1, H), lambda i: (0, 0)),     # weight_right
                pl.BlockSpec((tm, H), lambda i: (i, 0)),    # repres row tile
            ],
            out_specs=(pl.BlockSpec((tm, 1), lambda i: (i, 0)),
                       pl.BlockSpec((tm, 1), lambda i: (i, 0))),
        ),
        compiler_params=pltpu.CompilerParams(
            dimension_semantics=("parallel",)),
    )(weight_left, weight_right, r_pad)

    # Lay the left vector out lane-major (1, n_col) once, outside the N^2
    # kernel, so per-tile work is a pure broadcast-add (no lv.T per tile).
    left_row = jnp.reshape(left_col[:N], (1, N))
    if n_col != N:
        left_row = jnp.pad(left_row, ((0, 0), (0, n_col - N)))

    # ---- N^2 broadcast-add: only unavoidable traffic is the (N,N) output ---
    sim = pl.pallas_call(
        _bcast_add_kernel,
        out_shape=jax.ShapeDtypeStruct((n_row, n_col), out_dtype),
        grid_spec=pltpu.PrefetchScalarGridSpec(
            num_scalar_prefetch=0,
            grid=(n_row // tm, n_col // tn),
            in_specs=[
                pl.BlockSpec((tm, 1), lambda i, j: (i, 0)),   # right vector
                pl.BlockSpec((1, tn), lambda i, j: (0, j)),   # left vector
            ],
            out_specs=pl.BlockSpec((tm, tn), lambda i, j: (i, j)),
        ),
        compiler_params=pltpu.CompilerParams(
            dimension_semantics=("parallel", "parallel")),
    )(right_col, left_row)

    return sim[:N, :N]


def _xavier_normal(key, shape, gain):
    fan_out, fan_in = shape  # (1, hidden_size)
    std = gain * math.sqrt(2.0 / (fan_in + fan_out))
    return std * jax.random.normal(key, shape, dtype=jnp.float32)


if __name__ == "__main__":
    hidden_size = 32
    N = 8  # number of samples (rows of repres)

    key = jax.random.PRNGKey(0)
    k_wl, k_wr, k_x = jax.random.split(key, 3)

    gain = math.sqrt(2.0)  # nn.init.calculate_gain('relu')
    weight_left = _xavier_normal(k_wl, (1, hidden_size), gain)
    weight_right = _xavier_normal(k_wr, (1, hidden_size), gain)
    repres = jax.random.normal(k_x, (N, hidden_size), dtype=jnp.float32)

    sim = sample_weighter_forward(weight_left, weight_right, repres)
    sim = jax.block_until_ready(sim)

    # Reference check (plain JAX, mirrors the torch code exactly).
    left = weight_left @ repres.T      # (1, N)
    right = weight_right @ repres.T    # (1, N)
    sim_ref = left + right.T           # (N, N)
    assert sim.shape == (N, N)
    assert jnp.allclose(sim, sim_ref, atol=1e-5, rtol=1e-5)

    print("KERNEL_OK")
</pallas_src>

<mosaic_0001>
module attributes {stable_mosaic.version = 11 : i64} {
  func.func @_gemv_kernel(%arg0: i32, %arg1: memref<1x32xf32, #tpu.memory_space<vmem>>, %arg2: memref<1x32xf32, #tpu.memory_space<vmem>>, %arg3: memref<8x32xf32, #tpu.memory_space<vmem>>, %arg4: memref<8x1xf32, #tpu.memory_space<vmem>>, %arg5: memref<8x1xf32, #tpu.memory_space<vmem>>) attributes {dimension_semantics = [#tpu.dimension_semantics<parallel>], iteration_bounds = array<i64: 1>, scalar_prefetch = 0 : i64, scratch_operands = 0 : i64, tpu.core_type = #tpu.core_type<tc>, window_params = [{pipeline_mode = #tpu.pipeline_mode<synchronous>, transform_indices = @transform_0, window_bounds = array<i64: 1, 32>}, {pipeline_mode = #tpu.pipeline_mode<synchronous>, transform_indices = @transform_1, window_bounds = array<i64: 1, 32>}, {transform_indices = @transform_2, window_bounds = array<i64: 8, 32>}, {transform_indices = @transform_3, window_bounds = array<i64: 8, 1>}, {transform_indices = @transform_4, window_bounds = array<i64: 8, 1>}]} {
    %c0 = arith.constant 0 : index
    %c0_0 = arith.constant 0 : index
    %0 = vector.load %arg3[%c0, %c0_0] : memref<8x32xf32, #tpu.memory_space<vmem>>, vector<8x32xf32>
    %c0_1 = arith.constant 0 : index
    %c0_2 = arith.constant 0 : index
    %1 = vector.load %arg1[%c0_1, %c0_2] : memref<1x32xf32, #tpu.memory_space<vmem>>, vector<1x32xf32>
    %2 = vector.broadcast %1 : vector<1x32xf32> to vector<8x32xf32>
    %3 = arith.mulf %0, %2 : vector<8x32xf32>
    %cst = arith.constant dense<0.000000e+00> : vector<8xf32>
    %4 = vector.multi_reduction <add>, %3, %cst [1] : vector<8x32xf32> to vector<8xf32>
    %5 = vector.shape_cast %4 : vector<8xf32> to vector<8x1xf32>
    %c0_3 = arith.constant 0 : index
    %c0_4 = arith.constant 0 : index
    %6 = vector.load %arg4[%c0_3, %c0_4] : memref<8x1xf32, #tpu.memory_space<vmem>>, vector<8x1xf32>
    tpu.vector_store %arg4[%c0_3, %c0_4], %5 {strides = array<i32>} : memref<8x1xf32, #tpu.memory_space<vmem>>, vector<8x1xf32>,
    %c0_5 = arith.constant 0 : index
    %c0_6 = arith.constant 0 : index
    %7 = vector.load %arg2[%c0_5, %c0_6] : memref<1x32xf32, #tpu.memory_space<vmem>>, vector<1x32xf32>
    %8 = vector.broadcast %7 : vector<1x32xf32> to vector<8x32xf32>
    %9 = arith.mulf %0, %8 : vector<8x32xf32>
    %cst_7 = arith.constant dense<0.000000e+00> : vector<8xf32>
    %10 = vector.multi_reduction <add>, %9, %cst_7 [1] : vector<8x32xf32> to vector<8xf32>
    %11 = vector.shape_cast %10 : vector<8xf32> to vector<8x1xf32>
    %c0_8 = arith.constant 0 : index
    %c0_9 = arith.constant 0 : index
    %12 = vector.load %arg5[%c0_8, %c0_9] : memref<8x1xf32, #tpu.memory_space<vmem>>, vector<8x1xf32>
    tpu.vector_store %arg5[%c0_8, %c0_9], %11 {strides = array<i32>} : memref<8x1xf32, #tpu.memory_space<vmem>>, vector<8x1xf32>,
    return
  }
  func.func @transform_0(%arg0: i32) -> (i32, i32) {
    %c0_i32 = arith.constant 0 : i32
    %c0_i32_0 = arith.constant 0 : i32
    %c0_i32_1 = arith.constant 0 : i32
    return %c0_i32, %c0_i32_0 : i32, i32
  }
  func.func @transform_1(%arg0: i32) -> (i32, i32) {
    %c0_i32 = arith.constant 0 : i32
    %c0_i32_0 = arith.constant 0 : i32
    %c0_i32_1 = arith.constant 0 : i32
    return %c0_i32, %c0_i32_0 : i32, i32
  }
  func.func @transform_2(%arg0: i32) -> (i32, i32) {
    %c0_i32 = arith.constant 0 : i32
    %c0_i32_0 = arith.constant 0 : i32
    return %arg0, %c0_i32 : i32, i32
  }
  func.func @transform_3(%arg0: i32) -> (i32, i32) {
    %c0_i32 = arith.constant 0 : i32
    %c0_i32_0 = arith.constant 0 : i32
    return %arg0, %c0_i32 : i32, i32
  }
  func.func @transform_4(%arg0: i32) -> (i32, i32) {
    %c0_i32 = arith.constant 0 : i32
    %c0_i32_0 = arith.constant 0 : i32
    return %arg0, %c0_i32 : i32, i32
  }
}

</mosaic_0001>

<bundles_post_ra>
// kernel: tpu_custom_call.1
= control target key start
LH: loop header
LB: loop body
LE: loop exit
PB: predicated region body
PF: predicated region fallthrough
CT: control target
= control target key end

     0   :  { %10 = vsyncpa [#allocation3], 0  ;;  %s189_s0 = inlined_call_operand.hbm [shape: f32[1,32], index: 0, kind: input, shape index: {}]   ;;  %s190_s1 = inlined_call_operand.vmem [shape: f32[1,32], index: 1, kind: input, shape index: {}]   ;;  %s191_s2 = inlined_call_operand.hbm [shape: f32[8,32], index: 2, kind: input, shape index: {}]   ;;  %s192_s3 = inlined_call_operand.vmem [shape: f32[8,1], index: 3, kind: output, shape index: {0}]   ;;  %s193_s4 = inlined_call_operand.vmem [shape: f32[8,1], index: 4, kind: output, shape index: {1}]  }
   0x1   :  { %11 = vsyncpa [#allocation5], 0  ;;  %s129_s15 = smov [#allocation2]   ;;  %s130_s17 = smov [#allocation4]  }
   0x2   :  { %s18_s16 = sshll.u32 %s129_s15, 4  ;;  %s30_s18 = sshll.u32 %s130_s17, 4  ;;  %s19_s16 = int_to_ptr.vmem [resolvable:$true] %s18_s16  ;;  %s31_s18 = int_to_ptr.vmem [resolvable:$true] %s30_s18 }
   0x3   :  { %s81_s21 = scalar_lea.hbm %s189_s0, 16 }
   0x4   :  { %p82_p0 = scmp.ne.s32.totalorder %s189_s0, %s81_s21  ;;  %p85_p1 = scmp.lt.u32.totalorder %s81_s21, %s189_s0 }
   0x6   :  { %p87_p2 = pnand %p85_p1, %p82_p0 }
   0x8   :  { %90 = shalt.err (!%p87_p2)
}
   0x9   :  { %s91_s26 = scalar_lea.vmem %s19_s16, 16  ;;  %s95_s27 = scalar_lea.vmem %s19_s16, 32 }
   0xa   :  { %p92_p3 = scmp.ne.s32.totalorder %s19_s16, %s91_s26  ;;  %p96_p4 = scmp.lt.s32.totalorder %s19_s16, %s19_s16 }
   0xb   :  { %p97_p5 = scmp.lt.s32.totalorder %s95_s27, %s91_s26 }
   0xd   :  { %p98_p6 = por %p97_p5, %p96_p4 }
   0xf   :  { %p99_p7 = pnand %p98_p6, %p92_p3 }
  0x11   :  { %102 = shalt.err (!%p99_p7)
}
  0x12   :  { %21 = dma.hbm_to_vmem [thread:$0]  %s189_s0, 16, %s19_s16, [#allocation3]  }
  0x13   :  { %s103_s6 = scalar_lea.hbm %s191_s2, 128 }
  0x14   :  { %p104_p8 = scmp.ne.s32.totalorder %s191_s2, %s103_s6  ;;  %p107_p9 = scmp.lt.u32.totalorder %s103_s6, %s191_s2 }
  0x16   :  { %p109_p10 = pnand %p107_p9, %p104_p8 }
  0x18   :  { %112 = shalt.err (!%p109_p10)
}
  0x19   :  { %s113_s11 = scalar_lea.vmem %s31_s18, 128  ;;  %p118_p12 = scmp.lt.s32.totalorder %s31_s18, %s31_s18 }
  0x1a   :  { %p114_p11 = scmp.ne.s32.totalorder %s31_s18, %s113_s11  ;;  %p119_p13 = scmp.lt.s32.totalorder %s113_s11, %s113_s11 }
  0x1c   :  { %p120_p0 = por %p119_p13, %p118_p12 }
  0x1e   :  { %p121_p1 = pnand %p120_p0, %p114_p11 }
  0x20   :  { %124 = shalt.err (!%p121_p1)
}
  0x21   :  { %33 = dma.hbm_to_vmem [thread:$0]  %s191_s2, 128, %s31_s18, [#allocation5]  }
  0x22   :  { %125 = dma.done.wait [#allocation3], 16  }
  0x23   :  { %126 = vsyncadd [#allocation3], 4294967280 }
  0x24   :  { %127 = dma.done.wait [#allocation5], 128  }
  0x25   :  { %128 = vsyncadd [#allocation5], 4294967168  ;;  %v40_v0 = vld [vmem:[#allocation4] sm:$0xff]  ;;  %v77_v1 = vld [vmem:[#allocation2] ss:$0 sm:$0xff]  ;;  %vm49_vm0 = vcmask 261120  }
  0x26   :  { %v78_v2 = vld [vmem:[%s190_s1] ss:$0 sm:$0xff]  ;;  %v48_v3 = vmul.f32 %v77_v1, %v40_v0  ;;  %vm53_vm1 = vcmask 7168  }
  0x27   :  { %v62_v4 = vmul.f32 %v78_v2, %v40_v0 }
  0x28   :  { %v50_v5 = vsel %vm49_vm0, %v48_v3, 0.0 }
  0x29   :  { %51 = vadd.xlane.f32.xlu0 %v50_v5  ;;  %v63_v6 = vsel %vm49_vm0, %v62_v4, 0.0 }
  0x2d   :  { %64 = vadd.xlane.f32.xlu0 %v63_v6 }
  0xb6   :  { %v52_v7 = vpop.xlane.xlu0 %51 }
  0xb7   :  { %54 = vst.msk [vmem:[%s192_s3] sm:$0xff] %vm53_vm1, %v52_v7 }
  0xba   :  { %v65_v8 = vpop.xlane.xlu0 %64 }
  0xbb   :  { %66 = vst.msk [vmem:[%s193_s4] sm:$0xff] %vm53_vm1, %v65_v8 }
  0xbc   :  { %75 = vsyncpa [#allocation3], 1 }
  0xbd   :  { %76 = vsyncpa [#allocation5], 1 }

</bundles_post_ra>
